<compile_context>
chip_gen: v7x
topology: tpu7x:2x2x1
jax: 0.10.0
libtpu: 0.0.40
codegen_flags: <defaults>
</compile_context>

<pallas_src>
import jax
import jax.numpy as jnp
from jax.experimental import pallas as pl
from jax.experimental.pallas import tpu as pltpu


# ----------------------------------------------------------------------------
# Single-pass kernel: one grid step == Bblk batch rows, full (C, T) per row.
# ----------------------------------------------------------------------------
def _se_single_pass_kernel(x_ref, w1_ref, w2_ref, o_ref):
    # x_ref : (Bblk, C, T)   caller dtype
    # w1_ref: (C//r, C)      fc1.weight, original orientation
    # w2_ref: (C, C//r)      fc2.weight, original orientation
    # o_ref : (Bblk, C, T)   caller dtype (aliased onto x in HBM)
    w1 = w1_ref[...].astype(jnp.float32)
    w2 = w2_ref[...].astype(jnp.float32)
    for b in range(x_ref.shape[0]):  # Bblk is a small static constant
        xb = x_ref[b].astype(jnp.float32)                       # (C, T)
        # Squeeze: global average pool over time (reduce over lanes).
        y = jnp.mean(xb, axis=-1, keepdims=True)                # (C, 1)
        # Excite: Linear -> ReLU -> Linear -> sigmoid (all f32, tiny matvecs).
        h = jnp.maximum(
            jnp.dot(w1, y, preferred_element_type=jnp.float32), 0.0)   # (C//r, 1)
        g = jax.nn.sigmoid(
            jnp.dot(w2, h, preferred_element_type=jnp.float32))        # (C, 1)
        # Scale: broadcast the per-channel gate along the time (lane) axis.
        o_ref[b] = (xb * g).astype(o_ref.dtype)


# ----------------------------------------------------------------------------
# Wrapper — PyTorch interface: x (N, C, T), fc1.weight (C//r, C), fc2.weight (C, C//r)
# ----------------------------------------------------------------------------
def squeeze_excite_pallas(x, fc1_weight, fc2_weight, *,
                          force_two_pass=False, time_tile=None):
    B, C, T = x.shape
    Cr = fc1_weight.shape[0]
    assert fc1_weight.shape == (Cr, C) and fc2_weight.shape == (C, Cr)

    isz = jnp.dtype(x.dtype).itemsize
    bytes_per_batch = C * T * isz

    # Generation-aware VMEM budget: ~75% of physical capacity
    # (v7x: ~48 MiB of 64; v5e/v6e: ~96 MiB of 128).
    try:
        info = pltpu.get_tpu_info()
        vmem_cap = int(getattr(info, "vmem_capacity_bytes", 64 << 20))
    except Exception:  # pragma: no cover - defensive fallback
        vmem_cap = 64 << 20
    budget = (vmem_cap * 3) // 4

    w_bytes = C * Cr * (jnp.dtype(fc1_weight.dtype).itemsize +
                        jnp.dtype(fc2_weight.dtype).itemsize)
    fixed = w_bytes + (2 << 20)  # weights + slack for compiler-internal scratch

    # Single-pass viability: double-buffered in+out slabs plus f32 temps for
    # one batch row must fit the budget.
    per_batch_step = 4 * bytes_per_batch + 2 * C * T * 4
    single_pass_ok = (not force_two_pass) and (per_batch_step + fixed <= budget)

    if single_pass_ok:
        # ----- single pass: (Bblk, C, T) slab per grid step ------------------
        # Bblk: largest divisor of B with the input block in the ~2-8 MiB
        # sweet spot, preferring grid length >= 2 (two v7x TensorCores).
        limit = max(1, min(budget // (8 * bytes_per_batch),
                           (8 << 20) // max(1, bytes_per_batch)))
        divisors = [d for d in range(1, B + 1) if B % d == 0 and d <= limit]
        pref = [d for d in divisors if B // d >= 2]
        bblk = max(pref) if pref else max(divisors)

        return pl.pallas_call(
            _se_single_pass_kernel,
            out_shape=jax.ShapeDtypeStruct((B, C, T), x.dtype),
            grid=(B // bblk,),
            in_specs=[
                pl.BlockSpec((bblk, C, T), lambda i: (i, 0, 0)),
                pl.BlockSpec((Cr, C), lambda i: (0, 0)),
                pl.BlockSpec((C, Cr), lambda i: (0, 0)),
            ],
            out_specs=pl.BlockSpec((bblk, C, T), lambda i: (i, 0, 0)),
            input_output_aliases={0: 0},
            compiler_params=pltpu.CompilerParams(
                dimension_semantics=("parallel",),
                vmem_limit_bytes=int(budget)),
        )(x, fc1_weight, fc2_weight)

    # ----- two-pass fallback (long T): T-tiled reduce -> gate, then scale ----
    if time_tile is not None:
        tt = min(int(time_tile), T)
    else:
        target_block = max(1, min((budget - fixed) // 4, 8 << 20))
        tt = max(1, target_block // (C * isz))
        if tt < T:
            tt = max(128, (tt // 128) * 128)  # lane-dense stores
        tt = min(tt, T)
    n_t = pl.cdiv(T, tt)

    def _gate_kernel(x_ref, w1_ref, w2_ref, g_ref, acc_ref):
        # x_ref: (1, C, tt), g_ref: (1, C, 1), acc_ref: VMEM (C, 1) f32
        t = pl.program_id(1)

        @pl.when(t == 0)
        def _():
            acc_ref[...] = jnp.zeros_like(acc_ref)

        xf = x_ref[0].astype(jnp.float32)                      # (C, tt)
        if T % tt != 0:
            # Mask the ragged final tile so padding never biases the mean.
            col = jax.lax.broadcasted_iota(jnp.int32, xf.shape, 1)
            xf = jnp.where(t * tt + col < T, xf, 0.0)
        acc_ref[...] += jnp.sum(xf, axis=-1, keepdims=True)    # (C, 1)

        @pl.when(t == pl.num_programs(1) - 1)
        def _():
            y = acc_ref[...] * (1.0 / T)                       # true-T mean
            h = jnp.maximum(
                jnp.dot(w1_ref[...].astype(jnp.float32), y,
                        preferred_element_type=jnp.float32), 0.0)
            g = jax.nn.sigmoid(
                jnp.dot(w2_ref[...].astype(jnp.float32), h,
                        preferred_element_type=jnp.float32))
            g_ref[0] = g

    gates = pl.pallas_call(
        _gate_kernel,
        out_shape=jax.ShapeDtypeStruct((B, C, 1), jnp.float32),
        grid=(B, n_t),
        in_specs=[
            pl.BlockSpec((1, C, tt), lambda b, t: (b, 0, t)),
            pl.BlockSpec((Cr, C), lambda b, t: (0, 0)),
            pl.BlockSpec((C, Cr), lambda b, t: (0, 0)),
        ],
        out_specs=pl.BlockSpec((1, C, 1), lambda b, t: (b, 0, 0)),
        scratch_shapes=[pltpu.VMEM((C, 1), jnp.float32)],
        compiler_params=pltpu.CompilerParams(
            dimension_semantics=("parallel", "arbitrary"),
            vmem_limit_bytes=int(budget)),
    )(x, fc1_weight, fc2_weight)

    def _scale_kernel(x_ref, g_ref, o_ref):
        # x_ref: (1, C, tt), g_ref: (1, C, 1), o_ref: (1, C, tt)
        o_ref[0] = (x_ref[0].astype(jnp.float32) * g_ref[0]).astype(o_ref.dtype)

    return pl.pallas_call(
        _scale_kernel,
        out_shape=jax.ShapeDtypeStruct((B, C, T), x.dtype),
        grid=(B, n_t),
        in_specs=[
            pl.BlockSpec((1, C, tt), lambda b, t: (b, 0, t)),
            pl.BlockSpec((1, C, 1), lambda b, t: (b, 0, 0)),
        ],
        out_specs=pl.BlockSpec((1, C, tt), lambda b, t: (b, 0, t)),
        input_output_aliases={0: 0},
        compiler_params=pltpu.CompilerParams(
            dimension_semantics=("parallel", "parallel"),
            vmem_limit_bytes=int(budget)),
    )(x, gates)


# ----------------------------------------------------------------------------
# Pure-JAX reference (exact module math, f32) for the correctness check.
# ----------------------------------------------------------------------------
def squeeze_excite_ref(x_nct, fc1_weight, fc2_weight):
    hp = jax.lax.Precision.HIGHEST
    xf = x_nct.astype(jnp.float32)
    y = jnp.mean(xf, axis=2, keepdims=True)                    # gap -> (B, C, 1)
    y = jnp.swapaxes(y, 1, 2)                                  # (B, 1, C)
    y = jnp.maximum(jnp.einsum("boc,rc->bor", y, fc1_weight.astype(jnp.float32),
                               precision=hp), 0.0)
    y = jnp.einsum("bor,cr->boc", y, fc2_weight.astype(jnp.float32), precision=hp)
    y = jnp.swapaxes(y, 1, 2)                                  # (B, C, 1)
    return (xf * jax.nn.sigmoid(y)).astype(x_nct.dtype)


if __name__ == "__main__":
    def make_inputs(key, B, C, T, r):
        kx, k1, k2 = jax.random.split(key, 3)
        x = jax.random.normal(kx, (B, C, T), jnp.float32)       # PyTorch (N, C, T)
        # torch.nn.Linear default init: U(-1/sqrt(fan_in), 1/sqrt(fan_in)), bias=False
        b1 = 1.0 / (C ** 0.5)
        b2 = 1.0 / ((C // r) ** 0.5)
        w1 = jax.random.uniform(k1, (C // r, C), jnp.float32, -b1, b1)
        w2 = jax.random.uniform(k2, (C, C // r), jnp.float32, -b2, b2)
        return x, w1, w2

    key0, key1 = jax.random.split(jax.random.PRNGKey(0), 2)

    # 1) Main path: single-pass, batch-blocked (B=4 -> Bblk=2, grid=(2,) parallel).
    x, w1, w2 = make_inputs(key0, B=4, C=128, T=128, r=8)
    ref = jax.block_until_ready(squeeze_excite_ref(x, w1, w2))
    out = jax.block_until_ready(squeeze_excite_pallas(x, w1, w2))
    assert out.shape == x.shape and out.dtype == x.dtype
    err = float(jnp.max(jnp.abs(out - ref)))
    assert err < 1e-2, f"single-pass mismatch vs reference: max abs err = {err}"

    # 2) Long-T fallback: forced two-pass (T-tiled) with a ragged final tile.
    x2, w1b, w2b = make_inputs(key1, B=2, C=128, T=320, r=8)
    ref2 = jax.block_until_ready(squeeze_excite_ref(x2, w1b, w2b))
    out2 = jax.block_until_ready(
        squeeze_excite_pallas(x2, w1b, w2b, force_two_pass=True, time_tile=128))
    assert out2.shape == x2.shape and out2.dtype == x2.dtype
    err2 = float(jnp.max(jnp.abs(out2 - ref2)))
    assert err2 < 1e-2, f"two-pass mismatch vs reference: max abs err = {err2}"

    print("KERNEL_OK")
</pallas_src>

<mosaic_0001>
module attributes {stable_mosaic.version = 11 : i64} {
  func.func @_se_single_pass_kernel(%arg0: i32, %arg1: memref<2x128x128xf32, #tpu.memory_space<vmem>>, %arg2: memref<16x128xf32, #tpu.memory_space<vmem>>, %arg3: memref<128x16xf32, #tpu.memory_space<vmem>>, %arg4: memref<2x128x128xf32, #tpu.memory_space<vmem>>) attributes {dimension_semantics = [#tpu.dimension_semantics<parallel>], iteration_bounds = array<i64: 2>, scalar_prefetch = 0 : i64, scratch_operands = 0 : i64, tpu.core_type = #tpu.core_type<tc>, window_params = [{transform_indices = @transform_0, window_bounds = array<i64: 2, 128, 128>}, {pipeline_mode = #tpu.pipeline_mode<synchronous>, transform_indices = @transform_1, window_bounds = array<i64: 16, 128>}, {pipeline_mode = #tpu.pipeline_mode<synchronous>, transform_indices = @transform_2, window_bounds = array<i64: 128, 16>}, {transform_indices = @transform_3, window_bounds = array<i64: 2, 128, 128>}]} {
    %c0 = arith.constant 0 : index
    %c0_0 = arith.constant 0 : index
    %0 = vector.load %arg2[%c0, %c0_0] : memref<16x128xf32, #tpu.memory_space<vmem>>, vector<16x128xf32>
    %c0_1 = arith.constant 0 : index
    %c0_2 = arith.constant 0 : index
    %1 = vector.load %arg3[%c0_1, %c0_2] : memref<128x16xf32, #tpu.memory_space<vmem>>, vector<128x16xf32>
    %c0_3 = arith.constant 0 : index
    %c0_4 = arith.constant 0 : index
    %c0_5 = arith.constant 0 : index
    %2 = vector.load %arg1[%c0_3, %c0_4, %c0_5] : memref<2x128x128xf32, #tpu.memory_space<vmem>>, vector<1x128x128xf32>
    %3 = vector.shape_cast %2 : vector<1x128x128xf32> to vector<128x128xf32>
    %cst = arith.constant dense<0.000000e+00> : vector<128xf32>
    %4 = vector.multi_reduction <add>, %3, %cst [1] : vector<128x128xf32> to vector<128xf32>
    %5 = vector.shape_cast %4 : vector<128xf32> to vector<128x1xf32>
    %cst_6 = arith.constant 1.280000e+02 : f32
    %6 = vector.broadcast %cst_6 : f32 to vector<128x1xf32>
    %7 = arith.divf %5, %6 : vector<128x1xf32>
    %cst_7 = arith.constant dense<0.000000e+00> : vector<16x1xf32>
    %8 = tpu.matmul %0, %7, %cst_7 {dimension_numbers = #tpu.dot_dimension_numbers<[1], [0], [0], [1], [0, 0, 1, 1], [], []>} : vector<16x128xf32>, vector<128x1xf32>, vector<16x1xf32> -> vector<16x1xf32>
    %cst_8 = arith.constant 0.000000e+00 : f32
    %9 = vector.broadcast %cst_8 : f32 to vector<16x1xf32>
    %10 = arith.maximumf %8, %9 : vector<16x1xf32>
    %cst_9 = arith.constant dense<0.000000e+00> : vector<128x1xf32>
    %11 = tpu.matmul %1, %10, %cst_9 {dimension_numbers = #tpu.dot_dimension_numbers<[1], [0], [0], [1], [0, 0, 1, 1], [], []>} : vector<128x16xf32>, vector<16x1xf32>, vector<128x1xf32> -> vector<128x1xf32>
    %12 = arith.negf %11 : vector<128x1xf32>
    %13 = math.exp %12 : vector<128x1xf32>
    %cst_10 = arith.constant 1.000000e+00 : f32
    %14 = vector.broadcast %cst_10 : f32 to vector<128x1xf32>
    %15 = arith.addf %14, %13 : vector<128x1xf32>
    %16 = arith.divf %14, %15 : vector<128x1xf32>
    %17 = vector.broadcast %16 : vector<128x1xf32> to vector<128x128xf32>
    %18 = arith.mulf %3, %17 : vector<128x128xf32>
    %c0_11 = arith.constant 0 : index
    %c0_12 = arith.constant 0 : index
    %c0_13 = arith.constant 0 : index
    %19 = vector.load %arg4[%c0_11, %c0_12, %c0_13] : memref<2x128x128xf32, #tpu.memory_space<vmem>>, vector<1x128x128xf32>
    %20 = vector.shape_cast %19 : vector<1x128x128xf32> to vector<128x128xf32>
    %21 = vector.shape_cast %18 : vector<128x128xf32> to vector<1x128x128xf32>
    tpu.vector_store %arg4[%c0_11, %c0_12, %c0_13], %21 {strides = array<i32>} : memref<2x128x128xf32, #tpu.memory_space<vmem>>, vector<1x128x128xf32>,
    %c1 = arith.constant 1 : index
    %c0_14 = arith.constant 0 : index
    %c0_15 = arith.constant 0 : index
    %22 = vector.load %arg1[%c1, %c0_14, %c0_15] : memref<2x128x128xf32, #tpu.memory_space<vmem>>, vector<1x128x128xf32>
    %23 = vector.shape_cast %22 : vector<1x128x128xf32> to vector<128x128xf32>
    %cst_16 = arith.constant dense<0.000000e+00> : vector<128xf32>
    %24 = vector.multi_reduction <add>, %23, %cst_16 [1] : vector<128x128xf32> to vector<128xf32>
    %25 = vector.shape_cast %24 : vector<128xf32> to vector<128x1xf32>
    %cst_17 = arith.constant 1.280000e+02 : f32
    %26 = vector.broadcast %cst_17 : f32 to vector<128x1xf32>
    %27 = arith.divf %25, %26 : vector<128x1xf32>
    %cst_18 = arith.constant dense<0.000000e+00> : vector<16x1xf32>
    %28 = tpu.matmul %0, %27, %cst_18 {dimension_numbers = #tpu.dot_dimension_numbers<[1], [0], [0], [1], [0, 0, 1, 1], [], []>} : vector<16x128xf32>, vector<128x1xf32>, vector<16x1xf32> -> vector<16x1xf32>
    %cst_19 = arith.constant 0.000000e+00 : f32
    %29 = vector.broadcast %cst_19 : f32 to vector<16x1xf32>
    %30 = arith.maximumf %28, %29 : vector<16x1xf32>
    %cst_20 = arith.constant dense<0.000000e+00> : vector<128x1xf32>
    %31 = tpu.matmul %1, %30, %cst_20 {dimension_numbers = #tpu.dot_dimension_numbers<[1], [0], [0], [1], [0, 0, 1, 1], [], []>} : vector<128x16xf32>, vector<16x1xf32>, vector<128x1xf32> -> vector<128x1xf32>
    %32 = arith.negf %31 : vector<128x1xf32>
    %33 = math.exp %32 : vector<128x1xf32>
    %cst_21 = arith.constant 1.000000e+00 : f32
    %34 = vector.broadcast %cst_21 : f32 to vector<128x1xf32>
    %35 = arith.addf %34, %33 : vector<128x1xf32>
    %36 = arith.divf %34, %35 : vector<128x1xf32>
    %37 = vector.broadcast %36 : vector<128x1xf32> to vector<128x128xf32>
    %38 = arith.mulf %23, %37 : vector<128x128xf32>
    %c1_22 = arith.constant 1 : index
    %c0_23 = arith.constant 0 : index
    %c0_24 = arith.constant 0 : index
    %39 = vector.load %arg4[%c1_22, %c0_23, %c0_24] : memref<2x128x128xf32, #tpu.memory_space<vmem>>, vector<1x128x128xf32>
    %40 = vector.shape_cast %39 : vector<1x128x128xf32> to vector<128x128xf32>
    %41 = vector.shape_cast %38 : vector<128x128xf32> to vector<1x128x128xf32>
    tpu.vector_store %arg4[%c1_22, %c0_23, %c0_24], %41 {strides = array<i32>} : memref<2x128x128xf32, #tpu.memory_space<vmem>>, vector<1x128x128xf32>,
    return
  }
  func.func @transform_0(%arg0: i32) -> (i32, i32, i32) {
    %c0_i32 = arith.constant 0 : i32
    %c0_i32_0 = arith.constant 0 : i32
    %c0_i32_1 = arith.constant 0 : i32
    return %arg0, %c0_i32, %c0_i32_0 : i32, i32, i32
  }
  func.func @transform_1(%arg0: i32) -> (i32, i32) {
    %c0_i32 = arith.constant 0 : i32
    %c0_i32_0 = arith.constant 0 : i32
    %c0_i32_1 = arith.constant 0 : i32
    return %c0_i32, %c0_i32_0 : i32, i32
  }
  func.func @transform_2(%arg0: i32) -> (i32, i32) {
    %c0_i32 = arith.constant 0 : i32
    %c0_i32_0 = arith.constant 0 : i32
    %c0_i32_1 = arith.constant 0 : i32
    return %c0_i32, %c0_i32_0 : i32, i32
  }
  func.func @transform_3(%arg0: i32) -> (i32, i32, i32) {
    %c0_i32 = arith.constant 0 : i32
    %c0_i32_0 = arith.constant 0 : i32
    %c0_i32_1 = arith.constant 0 : i32
    return %arg0, %c0_i32, %c0_i32_0 : i32, i32, i32
  }
}

</mosaic_0001>

<bundles_post_ra>
// kernel: tpu_custom_call.1
= control target key start
LH: loop header
LB: loop body
LE: loop exit
PB: predicated region body
PF: predicated region fallthrough
CT: control target
= control target key end

     0   :  { %8 = vsyncpa [#allocation3], 0  ;;  %s2517_s0 = inlined_call_operand.hbm [shape: f32[4,128,128], index: 0, kind: input, shape index: {}, may-alias: {0,3}]   ;;  %s2518_s1 = inlined_call_operand.vmem [shape: f32[16,128], index: 1, kind: input, shape index: {}]   ;;  %s2519_s2 = inlined_call_operand.vmem [shape: f32[128,16], index: 2, kind: input, shape index: {}]   ;;  %s2520_s3 = inlined_call_operand.hbm [shape: f32[4,128,128], index: 3, kind: output, shape index: {}, may-alias: {0,3}]  }
   0x1   :  { %10 = vsyncpa [#allocation3 + $0x1], 0 }
   0x2   :  { %11 = vsyncpa [#allocation4], 0 }
   0x3   :  { %13 = vsyncpa [#allocation4 + $0x1], 0  ;;  %s2046_s12 = smov 0   ;;  %s2048_s13 = smov 0  }
   0x4   :  { %s2050_s14 = smov 0   ;;  %s2052_s15 = smov 0  }
   0x5 LB: > { %s2067_s16 = sadd.s32 4294967295, %s2017_s15   ;;  %s1338_s17 = sadd.s32 4294967294, %s2017_s15   ;;  %s2017_s15 = sphi %s2052_s15, %s2533_s15   ;;  %s2013_s14 = sphi %s2050_s14, %s2532_s14   ;;  %s2009_s13 = sphi %s2048_s13, %s2531_s13   ;;  %s2005_s12 = sphi %s2046_s12, %s2530_s12  }
   0x6   : > { %s2071_s18 = sadd.s32 1, %s2017_s15   ;;  %s26_s19 = sadd.s32 1, %s2013_s14 }
   0x7   : > { %s23_s20 = ssub.s32 %s2017_s15, %s2071_s18  ;;  %p33_p0 = scmp.ne.s32.totalorder %s2013_s14, %s2009_s13 }
   0x8   : > { %p24_p1 = scmp.eq.s32.totalorder %s23_s20, 0  ;;  %p34_p2 = scmp.eq.s32.totalorder %s2017_s15, 0 }
   0x9   : > { %p39_p3 = scmp.ne.s32.totalorder %s2009_s13, %s2005_s12  ;;  %p40_p4 = scmp.eq.s32.totalorder %s2067_s16, 0 }
   0xa   : > { %s2083_s21 = scalar_select %p24_p1, %s2013_s14, %s26_s19  }
   0xb   : > { %p2085_p5 = por %p34_p2, %p33_p0  ;;  %p2089_p6 = por %p40_p4, %p39_p3 }
   0xc   : > { %p105_p7 = scmp.eq.s32.totalorder %s2067_s16, 1  ;;  %p111_p8 = scmp.eq.s32.totalorder %s1338_s17, 1 }
   0xd   : > { %p1738_p10 = scmp.lt.s32.totalorder %s2017_s15, 2  ;;  %s137_s26 = sand.u32 1, %s2013_s14  }
   0xe   : > { %p2096_p11 = por %p105_p7, %p33_p0  ;;  %p2100_p12 = por %p111_p8, %p39_p3 }
   0xf   : > { %s1451_s27 = sshll.u32 %s2017_s15, 12  ;;  %s1341_s28 = sshll.u32 %s137_s26, 8 }
  0x10   : > { %s2524_s24 = scalar_select %p2096_p11, 1, 0 }
  0x11   : > { %s2525_s25 = scalar_select %p2100_p12, 1, 0 }
  0x12   : > { %s2109_s4 = scalar_lea.hbm %s2517_s0, %s1451_s27  ;;  %s141_s5 = scalar_lea.vmem [#allocation2], %s1341_s28 }
  0x13   : > { %s149_s6 = sshll.u32 %s141_s5, 4  ;;  %p2113_p13 = pnand %p1738_p10, %p2085_p5  ;;  %s2117_s6 = int_to_ptr.vmem [resolvable:$true] %s149_s6 }
  0x14   : > { %s2119_s8 = scalar_lea.sflag [#allocation3], %s137_s26  ;;  %s1921_s9 = scalar_lea.hbm %s2109_s4, 4096 }
  0x15   : > { %p1922_p0 = scmp.ne.s32.totalorder %s2109_s4, %s1921_s9  ;;  %p1923_p1 = pneg %p2113_p13 }
  0x16   : > { %s1926_s17 = scalar_lea.hbm %s2517_s0, 8192  ;;  %p1927_p4 = scmp.lt.u32.totalorder %s2109_s4, %s2517_s0 }
  0x17   : > { %p1924_p2 = pnand %p1923_p1, %p1922_p0  ;;  %p1928_p5 = scmp.lt.u32.totalorder %s1926_s17, %s1921_s9 }
  0x18   : > { %p1930_p8 = scmp.lt.u32.totalorder %s1921_s9, %s2109_s4 }
  0x19   : > { %p1925_p3 = pneg %p1924_p2  ;;  %p1929_p7 = por %p1928_p5, %p1927_p4 }
  0x1b   : > { %p1931_p10 = por %p1930_p8, %p1929_p7 }
  0x1d   : > { %p1932_p9 = pnand %p1931_p10, %p1925_p3 }
  0x1f   : > { %1935 = shalt.err (!%p1932_p9)
}
  0x20   : > { %s1936_s22 = scalar_lea.vmem %s2117_s6, 4096  ;;  %s2019_s26 = smov [#allocation2]  }
  0x21   : > { %p1937_p0 = scmp.ne.s32.totalorder %s2117_s6, %s1936_s22  ;;  %s1941_s27 = sshll.u32 %s2019_s26, 4  ;;  %s1942_s27 = int_to_ptr.vmem [resolvable:$false] %s1941_s27 }
  0x22   : > { %s1943_s28 = scalar_lea.vmem %s1942_s27, 8192  ;;  %p1944_p11 = scmp.lt.s32.totalorder %s2117_s6, %s1942_s27 }
  0x23   : > { %p1939_p2 = pnand %p1937_p0, %p1923_p1  ;;  %p1945_p4 = scmp.lt.s32.totalorder %s1943_s28, %s1936_s22 }
  0x25   : > { %p1940_p12 = pneg %p1939_p2  ;;  %p1946_p5 = por %p1945_p4, %p1944_p11 }
  0x27   : > { %p1947_p7 = pnand %p1946_p5, %p1940_p12 }
  0x29   : > { %1950 = shalt.err (!%p1947_p7)
}
  0x2a   : > { %s2020_s29 = smov 128   ;;  %s2021_s30 = smov 8  }
  0x2b   : > { %1733 = dma.hbm_to_vmem [thread:$0]  (!%p2113_p13), %s2109_s4, 4096, %s2117_s6, %s2119_s8, %s2020_s29, %s2020_s29, %s2021_s30  }
  0x2c   : > { %p1345_p9 = scmp.ge.s32.totalorder %s2017_s15, 1  ;;  %p157_p1 = scmp.lt.s32.totalorder %s2017_s15, 3 }
  0x2e   : > { %p158_p3 = pnand %p1345_p9, %p157_p1 }
  0x2f   : > { %s2150_s5 = sand.u32 (!%p158_p3), 1, %s2009_s13  }
  0x30   : > { %161 = sbr.rel (%p158_p3) target bundleno = 1126 (0x466), region = 32  ;;  %s1346_s9 = sshll.u32 (!%p158_p3), %s2150_s5, 8 }
  0x31   : > { %s164_s10 = scalar_lea.sflag (!%p158_p3), [#allocation3], %s2150_s5  ;;  %s2156_s11 = scalar_lea.vmem (!%p158_p3), [#allocation2], %s1346_s9 }
  0x37   : > { %1996 = dma.done.wait (%p2089_p6), %s164_s10, 4096  }
  0x38   : > { %1998 = vsyncadd (%p2089_p6), %s164_s10, 4294963200  ;;  %v2163_v0 = vld [vmem:[%s2156_s11 + $0x10] sm:$0xff]  ;;  %v2166_v1 = vld [vmem:[%s2156_s11] sm:$0xff]  ;;  %vm352_vm0 = vcmask 130048   ;;  %s2402_s19 = scalar_lea.vmem [#allocation5], %s1346_s9  ;;  %s1453_s9 = sshll.u32 %s2067_s16, 12 }
  0x39   : > { %230 = vadd.xlane.f32.xlu1 %v2163_v0  ;;  %226 = vadd.xlane.f32.xlu0 %v2166_v1  ;;  %v2171_v2 = vld [vmem:[%s2156_s11 + $0x18] sm:$0xff]  ;;  %v2174_v3 = vld [vmem:[%s2156_s11 + $0x8] sm:$0xff]  ;;  %v2182_v5 = vld [vmem:[%s2156_s11 + $0x20] sm:$0xff]  ;;  %s1265_s20 = sshll.u32 %s2402_s19, 4  ;;  %s2469_s27 = scalar_lea.hbm %s2520_s3, %s1453_s9  ;;  %s2471_s20 = int_to_ptr.vmem [resolvable:$true] %s1265_s20 }
  0x3a   : > { %v2179_v4 = vld [vmem:[%s2156_s11 + $0x28] sm:$0xff]  ;;  %v2187_v6 = vld [vmem:[%s2156_s11 + $0x38] sm:$0xff]  ;;  %v2190_v7 = vld [vmem:[%s2156_s11 + $0x30] sm:$0xff]  ;;  %s1251_s16 = scalar_lea.sflag [#allocation4], %s2150_s5  ;;  %s1951_s28 = scalar_lea.vmem %s2471_s20, 4096 }
  0x3b   : > { %v2195_v8 = vld [vmem:[%s2156_s11 + $0x48] sm:$0xff]  ;;  %v2198_v9 = vld [vmem:[%s2156_s11 + $0x40] sm:$0xff]  ;;  %v2203_v10 = vld [vmem:[%s2156_s11 + $0x58] sm:$0xff]  ;;  %p1952_p6 = scmp.ne.s32.totalorder %s2471_s20, %s1951_s28  ;;  %p2527_p11 = scmp.ne.s32.totalorder %s2524_s24, 0 }
  0x3c   : > { %v2206_v11 = vld [vmem:[%s2156_s11 + $0x50] sm:$0xff]  ;;  %v2211_v12 = vld [vmem:[%s2156_s11 + $0x68] sm:$0xff]  ;;  %v2214_v13 = vld [vmem:[%s2156_s11 + $0x60] sm:$0xff]  ;;  %s2023_s29 = smov [#allocation5]  }
  0x3d   : > { %232 = vadd.xlane.f32.xlu1 %v2171_v2  ;;  %228 = vadd.xlane.f32.xlu0 %v2174_v3  ;;  %v2219_v14 = vld [vmem:[%s2156_s11 + $0x78] sm:$0xff]  ;;  %v2222_v15 = vld [vmem:[%s2156_s11 + $0x70] sm:$0xff]  ;;  %v2229_v16 = vld [vmem:[%s2518_s1] sm:$0xff]  ;;  %p1953_p12 = pnand %p1952_p6, %p2527_p11  ;;  %s1955_s30 = sshll.u32 %s2023_s29, 4  ;;  %s1956_s30 = int_to_ptr.vmem [resolvable:$false] %s1955_s30 }
  0x3e   : > { %1558 = vmatprep.mubr.f32.mxu0 %v2229_v16  ;;  %v1381_v17 = vld [vmem:[%s2156_s11 + $0x88] sm:$0xff]  ;;  %v1380_v18 = vld [vmem:[%s2156_s11 + $0x80] sm:$0xff]  ;;  %v1383_v19 = vld [vmem:[%s2156_s11 + $0x98] sm:$0xff]  ;;  %s1957_s10 = scalar_lea.vmem %s1956_s30, 8192  ;;  %p1958_p8 = scmp.lt.s32.totalorder %s2471_s20, %s1956_s30 }
  0x3f   : > { %v1382_v20 = vld [vmem:[%s2156_s11 + $0x90] sm:$0xff]  ;;  %v1385_v21 = vld [vmem:[%s2156_s11 + $0xa8] sm:$0xff]  ;;  %v1384_v22 = vld [vmem:[%s2156_s11 + $0xa0] sm:$0xff]  ;;  %p1954_p13 = pneg %p1953_p12  ;;  %p1959_p10 = scmp.lt.s32.totalorder %s1957_s10, %s1951_s28 }
  0x40   : > { %v1387_v23 = vld [vmem:[%s2156_s11 + $0xb8] sm:$0xff]  ;;  %v1386_v24 = vld [vmem:[%s2156_s11 + $0xb0] sm:$0xff]  ;;  %v1389_v25 = vld [vmem:[%s2156_s11 + $0xc8] sm:$0xff] }
  0x41   : > { %236 = vadd.xlane.f32.xlu1 %v2179_v4  ;;  %234 = vadd.xlane.f32.xlu0 %v2182_v5  ;;  %v1388_v26 = vld [vmem:[%s2156_s11 + $0xc0] sm:$0xff]  ;;  %v2243_v27 = vld [vmem:[%s2156_s11 + $0xd8] sm:$0xff]  ;;  %v2246_v28 = vld [vmem:[%s2156_s11 + $0xd0] sm:$0xff]  ;;  %p1960_p0 = por %p1959_p10, %p1958_p8 }
  0x42   : > { %v1393_v29 = vld [vmem:[%s2156_s11 + $0xe8] sm:$0xff]  ;;  %v1392_v30 = vld [vmem:[%s2156_s11 + $0xe0] sm:$0xff]  ;;  %v1395_v31 = vld [vmem:[%s2156_s11 + $0xf8] sm:$0xff] }
  0x43   : > { %v1394_v32 = vld [vmem:[%s2156_s11 + $0xf0] sm:$0xff]  ;;  %p1961_p2 = pnand %p1960_p0, %p1954_p13 }
  0x45   : > { %240 = vadd.xlane.f32.xlu1 %v2187_v6  ;;  %238 = vadd.xlane.f32.xlu0 %v2190_v7 }
  0x49   : > { %244 = vadd.xlane.f32.xlu1 %v2195_v8  ;;  %242 = vadd.xlane.f32.xlu0 %v2198_v9 }
  0x4d   : > { %248 = vadd.xlane.f32.xlu1 %v2203_v10  ;;  %246 = vadd.xlane.f32.xlu0 %v2206_v11 }
  0x51   : > { %252 = vadd.xlane.f32.xlu1 %v2211_v12  ;;  %250 = vadd.xlane.f32.xlu0 %v2214_v13 }
  0x55   : > { %256 = vadd.xlane.f32.xlu1 %v2219_v14  ;;  %254 = vadd.xlane.f32.xlu0 %v2222_v15 }
  0x59   : > { %773 = vadd.xlane.f32.xlu1 %v1381_v17  ;;  %771 = vadd.xlane.f32.xlu0 %v1380_v18 }
  0x5d   : > { %777 = vadd.xlane.f32.xlu1 %v1383_v19  ;;  %775 = vadd.xlane.f32.xlu0 %v1382_v20 }
  0x61   : > { %781 = vadd.xlane.f32.xlu1 %v1385_v21  ;;  %779 = vadd.xlane.f32.xlu0 %v1384_v22 }
  0x65   : > { %785 = vadd.xlane.f32.xlu1 %v1387_v23  ;;  %783 = vadd.xlane.f32.xlu0 %v1386_v24 }
  0x69   : > { %789 = vadd.xlane.f32.xlu1 %v1389_v25  ;;  %787 = vadd.xlane.f32.xlu0 %v1388_v26  ;;  %v2257_v26 = vld [vmem:[%s2518_s1 + $0x8] sm:$0xff] }
  0x6d   : > { %793 = vadd.xlane.f32.xlu1 %v2243_v27  ;;  %791 = vadd.xlane.f32.xlu0 %v2246_v28 }
  0x71   : > { %797 = vadd.xlane.f32.xlu1 %v1393_v29  ;;  %795 = vadd.xlane.f32.xlu0 %v1392_v30  ;;  %v194_v29 = vld [vmem:[%s2519_s2] sm:$0xff] }
  0x72   : > { %1565 = vmatprep.mubr.msk.f32.mxu1 %vm352_vm0, %v194_v29 }
  0x75   : > { %801 = vadd.xlane.f32.xlu1 %v1395_v31  ;;  %799 = vadd.xlane.f32.xlu0 %v1394_v32 }
  0xc6   : > { %v231_v33 = vpop.xlane.xlu1 %230  ;;  %v227_v34 = vpop.xlane.xlu0 %226 }
  0xc7   : > { %v261_v37 = vmul.f32 0.0078125, %v231_v33  ;;  %v259_v38 = vmul.f32 0.0078125, %v227_v34 }
  0xca   : > { %v233_v35 = vpop.xlane.xlu1 %232  ;;  %v229_v36 = vpop.xlane.xlu0 %228 }
  0xcb   : > { %v262_v39 = vmul.f32 0.0078125, %v233_v35  ;;  %v260_v40 = vmul.f32 0.0078125, %v229_v36 }
  0xcd   : > { %v1652_v41 = vpack.c.bf16 %v260_v40, %v259_v38  ;;  %v1656_v44 = vpack.c.bf16 %v262_v39, %v261_v37 }
  0xce   : > { %v237_v42 = vpop.xlane.xlu1 %236  ;;  %v235_v43 = vpop.xlane.xlu0 %234 }
  0xcf   : > { %1653 = vmatprep.subr.bf16.mxu0 %v1652_v41  ;;  %v264_v45 = vmul.f32 0.0078125, %v237_v42  ;;  %v263_v46 = vmul.f32 0.0078125, %v235_v43 }
  0xd0   : > { %1655 = vmatpush3.bf16.msra.mxu0 %v1652_v41 }
  0xd1   : > { %1657 = vmatprep.subr.bf16.mxu0 %v1656_v44  ;;  %v1660_v47 = vpack.c.bf16 %v264_v45, %v263_v46 }
  0xd2   : > { %v241_v48 = vpop.xlane.xlu1 %240  ;;  %v239_v49 = vpop.xlane.xlu0 %238 }
  0xd3   : > { %v266_v50 = vmul.f32 0.0078125, %v241_v48  ;;  %v265_v51 = vmul.f32 0.0078125, %v239_v49  ;;  %v2268_v48 = vld [vmem:[%s2519_s2 + $0x8] sm:$0xff] }
  0xd4   : > { %1659 = vmatpush3.bf16.msra.mxu0 %v1656_v44 }
  0xd5   : > { %v1664_v52 = vpack.c.bf16 %v266_v50, %v265_v51  ;;  %1661 = vmatprep.subr.bf16.mxu0 %v1660_v47 }
  0xd6   : > { %v245_v53 = vpop.xlane.xlu1 %244  ;;  %v243_v54 = vpop.xlane.xlu0 %242 }
  0xd7   : > { %v268_v55 = vmul.f32 0.0078125, %v245_v53  ;;  %v267_v56 = vmul.f32 0.0078125, %v243_v54  ;;  %v2273_v54 = vld [vmem:[%s2519_s2 + $0x10] sm:$0xff] }
  0xd8   : > { %1663 = vmatpush3.bf16.msra.mxu0 %v1660_v47 }
  0xd9   : > { %v1668_v57 = vpack.c.bf16 %v268_v55, %v267_v56  ;;  %1665 = vmatprep.subr.bf16.mxu0 %v1664_v52  ;;  %v2282_v55 = vld [vmem:[%s2519_s2 + $0x18] sm:$0xff] }
  0xda   : > { %v249_v58 = vpop.xlane.xlu1 %248  ;;  %v247_v59 = vpop.xlane.xlu0 %246 }
  0xdb   : > { %v270_v60 = vmul.f32 0.0078125, %v249_v58  ;;  %v269_v61 = vmul.f32 0.0078125, %v247_v59  ;;  %v2287_v59 = vld [vmem:[%s2519_s2 + $0x20] sm:$0xff] }
  0xdc   : > { %1667 = vmatpush3.bf16.msra.mxu0 %v1664_v52 }
  0xdd   : > { %v1672_v62 = vpack.c.bf16 %v270_v60, %v269_v61  ;;  %1669 = vmatprep.subr.bf16.mxu0 %v1668_v57 }
  0xde   : > { %v253_v63 = vpop.xlane.xlu1 %252  ;;  %v251_v17 = vpop.xlane.xlu0 %250 }
  0xdf   : > { %v272_v18 = vmul.f32 0.0078125, %v253_v63  ;;  %v271_v19 = vmul.f32 0.0078125, %v251_v17 }
  0xe0   : > { %1671 = vmatpush3.bf16.msra.mxu0 %v1668_v57 }
  0xe1   : > { %v1676_v20 = vpack.c.bf16 %v272_v18, %v271_v19  ;;  %1673 = vmatprep.subr.bf16.mxu0 %v1672_v62  ;;  %v2301_v19 = vld [vmem:[%s2519_s2 + $0x30] sm:$0xff] }
  0xe2   : > { %v257_v21 = vpop.xlane.xlu1 %256  ;;  %v255_v22 = vpop.xlane.xlu0 %254 }
  0xe3   : > { %v274_v23 = vmul.f32 0.0078125, %v257_v21  ;;  %v273_v24 = vmul.f32 0.0078125, %v255_v22 }
  0xe4   : > { %1675 = vmatpush3.bf16.msra.mxu0 %v1672_v62  ;;  %v2296_v62 = vld [vmem:[%s2519_s2 + $0x28] sm:$0xff] }
  0xe5   : > { %v1680_v25 = vpack.c.bf16 %v274_v23, %v273_v24  ;;  %1677 = vmatprep.subr.bf16.mxu0 %v1676_v20 }
  0xe6   : > { %v774_v30 = vpop.xlane.xlu1 %773  ;;  %v772_v31 = vpop.xlane.xlu0 %771 }
  0xe7   : > { %v804_v37 = vmul.f32 0.0078125, %v774_v30  ;;  %v803_v38 = vmul.f32 0.0078125, %v772_v31  ;;  %v2324_v30 = vld [vmem:[%s2519_s2 + $0x48] sm:$0xff] }
  0xe8   : > { %1679 = vmatpush3.bf16.msra.mxu0 %v1676_v20  ;;  %v2310_v20 = vld [vmem:[%s2519_s2 + $0x38] sm:$0xff] }
  0xe9   : > { %1681 = vmatprep.subr.bf16.mxu0 %v1680_v25  ;;  %v1688_v44 = vpack.c.bf16 %v804_v37, %v803_v38  ;;  %v2335_v37 = vld [vmem:[%s2519_s2 + $0x58] sm:$0xff] }
  0xea   : > { %v778_v32 = vpop.xlane.xlu1 %777  ;;  %v776_v33 = vpop.xlane.xlu0 %775 }
  0xeb   : > { %v806_v46 = vmul.f32 0.0078125, %v778_v32  ;;  %v805_v47 = vmul.f32 0.0078125, %v776_v33 }
  0xec   : > { %1683 = vmatpush3.bf16.msra.mxu0 %v1680_v25 }
  0xed   : > { %v1692_v51 = vpack.c.bf16 %v806_v46, %v805_v47  ;;  %v2022_v46 = vmov 0  }
  0xee   : > { %v782_v34 = vpop.xlane.xlu1 %781  ;;  %v780_v35 = vpop.xlane.xlu0 %779  ;;  %1777 = vset.pattern.permute.xlu1 %v2022_v46  ;;  %1778 = vset.pattern.permute.xlu0 %v2022_v46 }
  0xef   : > { %1559 = vmatmul.mubr.f32.vlgmr.msra.gmra.mrb[0].mxu0 %v2257_v26  ;;  %v808_v52 = vmul.f32 0.0078125, %v782_v34  ;;  %v807_v53 = vmul.f32 0.0078125, %v780_v35  ;;  %v204_v34 = vld [vmem:[%s2519_s2 + $0x50] sm:$0xff] }
  0xf0   : > { %1628 = vmatprep.mubr.msk.f32.mxu0 %vm352_vm0, %v194_v29  ;;  %v2315_v29 = vld [vmem:[%s2519_s2 + $0x40] sm:$0xff] }
  0xf1   : > { %v1696_v56 = vpack.c.bf16 %v808_v52, %v807_v53 }
  0xf2   : > { %v786_v39 = vpop.xlane.xlu1 %785  ;;  %v784_v42 = vpop.xlane.xlu0 %783 }
  0xf3   : > { %v810_v57 = vmul.f32 0.0078125, %v786_v39  ;;  %v809_v58 = vmul.f32 0.0078125, %v784_v42  ;;  %v2349_v42 = vld [vmem:[%s2519_s2 + $0x68] sm:$0xff] }
  0xf5   : > { %v1700_v63 = vpack.c.bf16 %v810_v57, %v809_v58 }
  0xf6   : > { %v790_v49 = vpop.xlane.xlu1 %789  ;;  %v788_v50 = vpop.xlane.xlu0 %787 }
  0xf7   : > { %v812_v17 = vmul.f32 0.0078125, %v790_v49  ;;  %v811_v18 = vmul.f32 0.0078125, %v788_v50 }
  0xf9   : > { %v1704_v23 = vpack.c.bf16 %v812_v17, %v811_v18 }
  0xfa   : > { %v794_v60 = vpop.xlane.xlu1 %793  ;;  %v792_v61 = vpop.xlane.xlu0 %791 }
  0xfb   : > { %v814_v24 = vmul.f32 0.0078125, %v794_v60  ;;  %v813_v25 = vmul.f32 0.0078125, %v792_v61 }
  0xfd   : > { %v1708_v31 = vpack.c.bf16 %v814_v24, %v813_v25 }
  0xfe   : > { %v798_v21 = vpop.xlane.xlu1 %797  ;;  %v796_v22 = vpop.xlane.xlu0 %795 }
  0xff   : > { %v816_v32 = vmul.f32 0.0078125, %v798_v21  ;;  %v815_v33 = vmul.f32 0.0078125, %v796_v22 }
 0x101   : > { %v1712_v38 = vpack.c.bf16 %v816_v32, %v815_v33 }
 0x102   : > { %v802_v35 = vpop.xlane.xlu1 %801 }
 0x103   : > { %v818_v39 = vmul.f32 0.0078125, %v802_v35 }
 0x1c2   : > { %v1560_v36 = vpop.f32.mrb[0].mxu0 }
 0x1c3   : > { %v351_v40 = vmax.f32 %v1560_v36, 0.0  ;;  %v341_v41 = vpop.f32.mrb[1].mxu0  ;;  %v800_v36 = vpop.xlane.xlu0 %799 }
 0x1c4   : > { %v350_v43 = vmax.f32 %v341_v41, 0.0  ;;  %v2340_v41 = vld [vmem:[%s2519_s2 + $0x60] sm:$0xff] }
 0x1c6   : > { %v1684_v45 = vpack.c.bf16 %v351_v40, %v350_v43  ;;  %v817_v40 = vmul.f32 0.0078125, %v800_v36 }
 0x1c8   : > { %1685 = vmatprep.subr.bf16.mxu1 %v1684_v45  ;;  %v1716_v43 = vpack.c.bf16 %v818_v39, %v817_v40 }
 0x1c9   : > { %1687 = vmatpush3.bf16.msra.mxu1 %v1684_v45  ;;  %v2363_v45 = vld [vmem:[%s2519_s2 + $0x78] sm:$0xff] }
 0x1ca   : > { %1689 = vmatprep.subr.bf16.mxu1 %v1688_v44 }
 0x1cc   : > { %1566 = vmatmul.mubr.msk.f32.vlgmr.msra.gmra.mrb[0].mxu1 %vm352_vm0, %v2268_v48 }
 0x1cd   : > { %1691 = vmatpush3.bf16.msra.mxu1 %v1688_v44  ;;  %1568 = vmatprep.mubr.msk.f32.mxu1 %vm352_vm0, %v2273_v54  ;;  %v2354_v44 = vld [vmem:[%s2519_s2 + $0x70] sm:$0xff] }
 0x1ce   : > { %1693 = vmatprep.subr.bf16.mxu1 %v1692_v51 }
 0x1d0   : > { %1569 = vmatmul.mubr.msk.f32.gmra.mrb[2].mxu1 %vm352_vm0, %v2282_v55 }
 0x1d1   : > { %1695 = vmatpush3.bf16.msra.mxu1 %v1692_v51  ;;  %1571 = vmatprep.mubr.msk.f32.mxu1 %vm352_vm0, %v2287_v59 }
 0x1d2   : > { %1697 = vmatprep.subr.bf16.mxu1 %v1696_v56 }
 0x1d4   : > { %1572 = vmatmul.mubr.msk.f32.gmra.mrb[4].mxu1 %vm352_vm0, %v2296_v62 }
 0x1d5   : > { %1699 = vmatpush3.bf16.msra.mxu1 %v1696_v56  ;;  %1574 = vmatprep.mubr.msk.f32.mxu1 %vm352_vm0, %v2301_v19 }
 0x1d6   : > { %1701 = vmatprep.subr.bf16.mxu1 %v1700_v63 }
 0x1d8   : > { %1575 = vmatmul.mubr.msk.f32.gmra.mrb[6].mxu1 %vm352_vm0, %v2310_v20 }
 0x1d9   : > { %1703 = vmatpush3.bf16.msra.mxu1 %v1700_v63  ;;  %1577 = vmatprep.mubr.msk.f32.mxu1 %vm352_vm0, %v2315_v29 }
 0x1da   : > { %1705 = vmatprep.subr.bf16.mxu1 %v1704_v23 }
 0x1dc   : > { %1578 = vmatmul.mubr.msk.f32.gmra.mrb[8].mxu1 %vm352_vm0, %v2324_v30 }
 0x1dd   : > { %1707 = vmatpush3.bf16.msra.mxu1 %v1704_v23  ;;  %1580 = vmatprep.mubr.msk.f32.mxu1 %vm352_vm0, %v204_v34 }
 0x1de   : > { %1709 = vmatprep.subr.bf16.mxu1 %v1708_v31 }
 0x1e0   : > { %1581 = vmatmul.mubr.msk.f32.gmra.mrb[10].mxu1 %vm352_vm0, %v2335_v37 }
 0x1e1   : > { %1711 = vmatpush3.bf16.msra.mxu1 %v1708_v31  ;;  %1583 = vmatprep.mubr.msk.f32.mxu1 %vm352_vm0, %v2340_v41 }
 0x1e2   : > { %1713 = vmatprep.subr.bf16.mxu1 %v1712_v38 }
 0x1e4   : > { %1584 = vmatmul.mubr.msk.f32.gmra.mrb[12].mxu1 %vm352_vm0, %v2349_v42 }
 0x1e5   : > { %1715 = vmatpush3.bf16.msra.mxu1 %v1712_v38  ;;  %1586 = vmatprep.mubr.msk.f32.mxu1 %vm352_vm0, %v2354_v44 }
 0x1e6   : > { %1717 = vmatprep.subr.bf16.mxu1 %v1716_v43 }
 0x1e8   : > { %1587 = vmatmul.mubr.msk.f32.gmra.mrb[14].mxu1 %vm352_vm0, %v2363_v45 }
 0x1e9   : > { %1719 = vmatpush3.bf16.msra.mxu1 %v1716_v43  ;;  %1621 = vmatprep.mubr.f32.mxu1 %v2229_v16 }
 0x1ec   : > { %1622 = vmatmul.mubr.f32.vlgmr.msra.gmra.mrb[16].mxu1 %v2257_v26 }
 0x1ed   : > { %1643 = vmatprep.mubr.msk.f32.mxu1 %vm352_vm0, %v204_v34 }
 0x29f   : > { %v1567_v47 = vpop.f32.mrb[0].mxu1 }
 0x2a0   : > { %v1365_v49 = vmul.f32 -1.442695, %v1567_v47  ;;  %v467_v50 = vpop.f32.mrb[1].mxu1 }
 0x2a1   : > { %v1364_v51 = vmul.f32 -1.442695, %v467_v50 }
 0x2a2   : > { %1779 = vpow2.f32 %v1365_v49 }
 0x2a3   : > { %1781 = vpow2.f32 %v1364_v51  ;;  %v1570_v52 = vpop.f32.mrb[2].mxu1 }
 0x2a4   : > { %v1367_v53 = vmul.f32 -1.442695, %v1570_v52  ;;  %v477_v56 = vpop.f32.mrb[3].mxu1 }
 0x2a5   : > { %v1366_v57 = vmul.f32 -1.442695, %v477_v56 }
 0x2a6   : > { %1783 = vpow2.f32 %v1367_v53 }
 0x2a7   : > { %1785 = vpow2.f32 %v1366_v57  ;;  %v1573_v16 = vpop.f32.mrb[4].mxu1 }
 0x2a8   : > { %v1369_v58 = vmul.f32 -1.442695, %v1573_v16  ;;  %v487_v26 = vpop.f32.mrb[5].mxu1 }
 0x2a9   : > { %v1368_v60 = vmul.f32 -1.442695, %v487_v26 }
 0x2aa   : > { %1787 = vpow2.f32 %v1369_v58 }
 0x2ab   : > { %v1576_v61 = vpop.f32.mrb[6].mxu1  ;;  %1789 = vpow2.f32 %v1368_v60 }
 0x2ac   : > { %v1780_v63 = vpop.eup %1779  ;;  %v1371_v17 = vmul.f32 -1.442695, %v1576_v61  ;;  %v497_v18 = vpop.f32.mrb[7].mxu1 }
 0x2ad   : > { %v1782_v21 = vpop.eup %1781  ;;  %v595_v22 = vadd.f32 1.0, %v1780_v63  ;;  %v1370_v31 = vmul.f32 -1.442695, %v497_v18 }
 0x2ae   : > { %v594_v23 = vadd.f32 1.0, %v1782_v21  ;;  %1791 = vpow2.f32 %v1371_v17 }
 0x2af   : > { %1793 = vrcp.f32 %v595_v22  ;;  %v1579_v24 = vpop.f32.mrb[8].mxu1 }
 0x2b0   : > { %v1784_v25 = vpop.eup %1783  ;;  %1795 = vrcp.f32 %v594_v23  ;;  %v1373_v32 = vmul.f32 -1.442695, %v1579_v24  ;;  %v507_v33 = vpop.f32.mrb[9].mxu1 }
 0x2b1   : > { %v1786_v34 = vpop.eup %1785  ;;  %v597_v35 = vadd.f32 1.0, %v1784_v25  ;;  %v1372_v46 = vmul.f32 -1.442695, %v507_v33 }
 0x2b2   : > { %1797 = vpow2.f32 %v1373_v32  ;;  %v596_v36 = vadd.f32 1.0, %v1786_v34 }
 0x2b3   : > { %1799 = vrcp.f32 %v597_v35  ;;  %v1582_v38 = vpop.f32.mrb[10].mxu1 }
 0x2b4   : > { %v1788_v39 = vpop.eup %1787  ;;  %1801 = vpow2.f32 %v1370_v31  ;;  %v1375_v40 = vmul.f32 -1.442695, %v1582_v38  ;;  %v517_v43 = vpop.f32.mrb[11].mxu1 }
 0x2b5   : > { %v1790_v47 = vpop.eup %1789  ;;  %v599_v49 = vadd.f32 1.0, %v1788_v39  ;;  %v1374_v58 = vmul.f32 -1.442695, %v517_v43 }
 0x2b6   : > { %1803 = vpow2.f32 %v1375_v40  ;;  %v598_v57 = vadd.f32 1.0, %v1790_v47 }
 0x2b7   : > { %1805 = vrcp.f32 %v596_v36  ;;  %v1585_v50 = vpop.f32.mrb[12].mxu1 }
 0x2b8   : > { %v1792_v51 = vpop.eup %1791  ;;  %v1377_v52 = vmul.f32 -1.442695, %v1585_v50  ;;  %v527_v53 = vpop.f32.mrb[13].mxu1  ;;  %1807 = vpow2.f32 %v1372_v46 }
 0x2b9   : > { %v1794_v56 = vpop.eup %1793  ;;  %v601_v18 = vadd.f32 1.0, %v1792_v51  ;;  %v1376_v23 = vmul.f32 -1.442695, %v527_v53 }
 0x2ba   : > { %v1796_v16 = vpop.eup %1795  ;;  %1809 = vpow2.f32 %v1377_v52  ;;  %649 = vperm.xlu1 %1777, %v1794_v56  }
 0x2bb   : > { %1811 = vrcp.f32 %v599_v49  ;;  %644 = vperm.xlu0 %1778, %v1796_v16   ;;  %v1588_v26 = vpop.f32.mrb[14].mxu1 }
 0x2bc   : > { %v1798_v60 = vpop.eup %1797  ;;  %v1379_v61 = vmul.f32 -1.442695, %v1588_v26  ;;  %v537_v63 = vpop.f32.mrb[15].mxu1  ;;  %1813 = vrcp.f32 %v598_v57 }
 0x2bd   : > { %v1800_v17 = vpop.eup %1799  ;;  %v603_v21 = vadd.f32 1.0, %v1798_v60  ;;  %1815 = vpow2.f32 %v1374_v58  ;;  %v1378_v38 = vmul.f32 -1.442695, %v537_v63 }
 0x2be   : > { %v1802_v22 = vpop.eup %1801  ;;  %659 = vperm.xlu1 %1777, %v1800_v17  }
 0x2bf   : > { %1817 = vrcp.f32 %v603_v21  ;;  %v1623_v24 = vpop.f32.mrb[16].mxu1  ;;  %v600_v34 = vadd.f32 1.0, %v1802_v22 }
 0x2c0   : > { %v1804_v25 = vpop.eup %1803  ;;  %1819 = vpow2.f32 %v1379_v61  ;;  %v895_v31 = vmax.f32 %v1623_v24, 0.0  ;;  %v885_v32 = vpop.f32.mrb[17].mxu1 }
 0x2c1   : > { %v1806_v33 = vpop.eup %1805  ;;  %1821 = vrcp.f32 %v601_v18  ;;  %v605_v35 = vadd.f32 1.0, %v1804_v25  ;;  %v894_v36 = vmax.f32 %v885_v32, 0.0 }
 0x2c2   : > { %1823 = vpow2.f32 %v1376_v23  ;;  %654 = vperm.xlu1 %1777, %v1806_v33   ;;  %v1808_v39 = vpop.eup %1807 }
 0x2c3   : > { %1825 = vrcp.f32 %v605_v35  ;;  %v1720_v40 = vpack.c.bf16 %v895_v31, %v894_v36  ;;  %v602_v50 = vadd.f32 1.0, %v1808_v39 }
 0x2c4   : > { %v1810_v43 = vpop.eup %1809  ;;  %1827 = vrcp.f32 %v600_v34 }
 0x2c5   : > { %v1812_v46 = vpop.eup %1811  ;;  %v607_v47 = vadd.f32 1.0, %v1810_v43  ;;  %1721 = vmatprep.subr.bf16.mxu0 %v1720_v40  ;;  %1724 = vmatprep.subr.bf16.mxu1 %v1720_v40  ;;  %1829 = vpow2.f32 %v1378_v38 }
 0x2c6   : > { %669 = vperm.xlu1 %1777, %v1812_v46   ;;  %1723 = vmatpush3.bf16.msra.mxu0 %v1720_v40  ;;  %v1814_v49 = vpop.eup %1813 }
 0x2c7   : > { %1831 = vrcp.f32 %v607_v47  ;;  %1725 = vmatpush3.bf16.msra.mxu1 %v1720_v40  ;;  %v1816_v51 = vpop.eup %1815 }
 0x2c8   : > { %1833 = vrcp.f32 %v602_v50  ;;  %v604_v57 = vadd.f32 1.0, %v1816_v51 }
 0x2c9   : > { %v1818_v52 = vpop.eup %1817  ;;  %1629 = vmatmul.mubr.msk.f32.vlgmr.msra.gmra.mrb[2].mxu0 %vm352_vm0, %v2268_v48 }
 0x2ca   : > { %v1820_v53 = vpop.eup %1819  ;;  %664 = vperm.xlu1 %1777, %v1814_v49   ;;  %689 = vperm.xlu0 %1778, %v1818_v52  }
 0x2cb   : > { %v1822_v56 = vpop.eup %1821  ;;  %v609_v16 = vadd.f32 1.0, %v1820_v53  ;;  %1644 = vmatmul.mubr.msk.f32.vlgmr.msra.gmra.mrb[18].mxu1 %vm352_vm0, %v2335_v37  ;;  %1631 = vmatprep.mubr.msk.f32.mxu0 %vm352_vm0, %v2273_v54 }
 0x2cc   : > { %v1824_v58 = vpop.eup %1823  ;;  %1646 = vmatprep.mubr.msk.f32.mxu1 %vm352_vm0, %v2340_v41 }
 0x2cd   : > { %v1826_v26 = vpop.eup %1825  ;;  %1835 = vrcp.f32 %v609_v16  ;;  %1632 = vmatmul.mubr.msk.f32.gmra.mrb[4].mxu0 %vm352_vm0, %v2282_v55  ;;  %v606_v60 = vadd.f32 1.0, %v1824_v58 }
 0x2ce   : > { %679 = vperm.xlu1 %1777, %v1822_v56   ;;  %699 = vperm.xlu0 %1778, %v1826_v26   ;;  %v1828_v48 = vpop.eup %1827  ;;  %1837 = vrcp.f32 %v604_v57 }
 0x2cf   : > { %1647 = vmatmul.mubr.msk.f32.gmra.mrb[20].mxu1 %vm352_vm0, %v2349_v42  ;;  %1634 = vmatprep.mubr.msk.f32.mxu0 %vm352_vm0, %v2287_v59  ;;  %v1830_v54 = vpop.eup %1829  ;;  %1839 = vrcp.f32 %v606_v60 }
 0x2d0   : > { %1649 = vmatprep.mubr.msk.f32.mxu1 %vm352_vm0, %v2354_v44  ;;  %v608_v55 = vadd.f32 1.0, %v1830_v54 }
 0x2d1   : > { %v1832_v37 = vpop.eup %1831  ;;  %1635 = vmatmul.mubr.msk.f32.gmra.mrb[6].mxu0 %vm352_vm0, %v2296_v62 }
 0x2d2   : > { %674 = vperm.xlu1 %1777, %v1828_v48   ;;  %709 = vperm.xlu0 %1778, %v1832_v37   ;;  %v1834_v41 = vpop.eup %1833  ;;  %1841 = vrcp.f32 %v608_v55 }
 0x2d3   : > { %1637 = vmatprep.mubr.msk.f32.mxu0 %vm352_vm0, %v2301_v19  ;;  %1650 = vmatmul.mubr.msk.f32.gmra.mrb[22].mxu1 %vm352_vm0, %v2363_v45 }
 0x2d5   : > { %1638 = vmatmul.mubr.msk.f32.gmra.mrb[8].mxu0 %vm352_vm0, %v2310_v20 }
 0x2d6   : > { %684 = vperm.xlu1 %1777, %v1834_v41   ;;  %1640 = vmatprep.mubr.msk.f32.mxu0 %vm352_vm0, %v2315_v29 }
 0x2d7   : > { %v1836_v59 = vpop.eup %1835 }
 0x2d8   : > { %719 = vperm.xlu0 %1778, %v1836_v59   ;;  %v1838_v62 = vpop.eup %1837 }
 0x2d9   : > { %1641 = vmatmul.mubr.msk.f32.gmra.mrb[10].mxu0 %vm352_vm0, %v2324_v30  ;;  %v1840_v19 = vpop.eup %1839 }
 0x2da   : > { %694 = vperm.xlu1 %1777, %v1838_v62  }
 0x2dc   : > { %v1842_v42 = vpop.eup %1841 }
 0x2de   : > { %704 = vperm.xlu1 %1777, %v1840_v19  }
 0x2e2   : > { %714 = vperm.xlu1 %1777, %v1842_v42  }
 0x339   : > { %v650_v44 = vpop.permute.xlu1 %649 }
 0x33a   : > { %v723_v20 = vmul.f32 %v650_v44, %v2174_v3  ;;  %v645_v45 = vpop.permute.xlu0 %644 }
 0x33b   : > { %v722_v61 = vmul.f32 %v645_v45, %v2166_v1 }
 0x33c   : > { %739 = vst [vmem:[%s2402_s19 + $0x8] sm:$0xff] %v723_v20 }
 0x33d   : > { %738 = vst [vmem:[%s2402_s19] sm:$0xff] %v722_v61  ;;  %v660_v29 = vpop.permute.xlu1 %659 }
 0x33e   : > { %v725_v30 = vmul.f32 %v660_v29, %v2171_v2 }
 0x340   : > { %741 = vst [vmem:[%s2402_s19 + $0x18] sm:$0xff] %v725_v30 }
 0x341   : > { %v655_v3 = vpop.permute.xlu1 %654 }
 0x342   : > { %v724_v1 = vmul.f32 %v655_v3, %v2163_v0 }
 0x344   : > { %740 = vst [vmem:[%s2402_s19 + $0x10] sm:$0xff] %v724_v1 }
 0x345   : > { %v670_v63 = vpop.permute.xlu1 %669 }
 0x346   : > { %v727_v17 = vmul.f32 %v670_v63, %v2179_v4 }
 0x348   : > { %743 = vst [vmem:[%s2402_s19 + $0x28] sm:$0xff] %v727_v17 }
 0x349   : > { %v665_v18 = vpop.permute.xlu1 %664  ;;  %v690_v21 = vpop.permute.xlu0 %689 }
 0x34a   : > { %v726_v22 = vmul.f32 %v665_v18, %v2182_v5  ;;  %v731_v23 = vmul.f32 %v690_v21, %v2195_v8 }
 0x34c   : > { %742 = vst [vmem:[%s2402_s19 + $0x20] sm:$0xff] %v726_v22  ;;  %747 = vst [vmem:[%s2402_s19 + $0x48] sm:$0xff] %v731_v23 }
 0x34d   : > { %v680_v2 = vpop.permute.xlu1 %679  ;;  %v700_v24 = vpop.permute.xlu0 %699 }
 0x34e   : > { %v729_v0 = vmul.f32 %v680_v2, %v2187_v6  ;;  %v733_v25 = vmul.f32 %v700_v24, %v2203_v10 }
 0x350   : > { %745 = vst [vmem:[%s2402_s19 + $0x38] sm:$0xff] %v729_v0  ;;  %749 = vst [vmem:[%s2402_s19 + $0x58] sm:$0xff] %v733_v25 }
 0x351   : > { %v675_v4 = vpop.permute.xlu1 %674  ;;  %v710_v31 = vpop.permute.xlu0 %709 }
 0x352   : > { %v728_v5 = vmul.f32 %v675_v4, %v2190_v7  ;;  %v735_v8 = vmul.f32 %v710_v31, %v2211_v12 }
 0x354   : > { %744 = vst [vmem:[%s2402_s19 + $0x30] sm:$0xff] %v728_v5  ;;  %751 = vst [vmem:[%s2402_s19 + $0x68] sm:$0xff] %v735_v8 }
 0x355   : > { %v685_v32 = vpop.permute.xlu1 %684 }
 0x356   : > { %v730_v33 = vmul.f32 %v685_v32, %v2198_v9 }
 0x357   : > { %v720_v6 = vpop.permute.xlu0 %719 }
 0x358   : > { %746 = vst [vmem:[%s2402_s19 + $0x40] sm:$0xff] %v730_v33  ;;  %v737_v10 = vmul.f32 %v720_v6, %v2219_v14 }
 0x359   : > { %v695_v34 = vpop.permute.xlu1 %694 }
 0x35a   : > { %753 = vst [vmem:[%s2402_s19 + $0x78] sm:$0xff] %v737_v10  ;;  %v732_v35 = vmul.f32 %v695_v34, %v2206_v11 }
 0x35c   : > { %748 = vst [vmem:[%s2402_s19 + $0x50] sm:$0xff] %v732_v35 }
 0x35d   : > { %v705_v36 = vpop.permute.xlu1 %704 }
 0x35e   : > { %v734_v7 = vmul.f32 %v705_v36, %v2214_v13 }
 0x360   : > { %750 = vst [vmem:[%s2402_s19 + $0x60] sm:$0xff] %v734_v7 }
 0x361   : > { %v715_v12 = vpop.permute.xlu1 %714 }
 0x362   : > { %v736_v38 = vmul.f32 %v715_v12, %v2222_v15 }
 0x364   : > { %752 = vst [vmem:[%s2402_s19 + $0x70] sm:$0xff] %v736_v38 }
 0x39c   : > { %v1630_v39 = vpop.f32.mrb[2].mxu0 }
 0x39d   : > { %v1413_v40 = vmul.f32 -1.442695, %v1630_v39  ;;  %v962_v9 = vpop.f32.mrb[3].mxu0 }
 0x39e   : > { %v1412_v43 = vmul.f32 -1.442695, %v962_v9  ;;  %v1645_v46 = vpop.f32.mrb[18].mxu1 }
 0x39f   : > { %1843 = vpow2.f32 %v1413_v40  ;;  %v1423_v14 = vmul.f32 -1.442695, %v1645_v46  ;;  %v1012_v47 = vpop.f32.mrb[19].mxu1 }
 0x3a0   : > { %1845 = vpow2.f32 %v1412_v43  ;;  %v1422_v49 = vmul.f32 -1.442695, %v1012_v47  ;;  %v1633_v11 = vpop.f32.mrb[4].mxu0 }
 0x3a1   : > { %1847 = vpow2.f32 %v1423_v14  ;;  %v1415_v50 = vmul.f32 -1.442695, %v1633_v11  ;;  %v972_v51 = vpop.f32.mrb[5].mxu0 }
 0x3a2   : > { %1849 = vpow2.f32 %v1422_v49  ;;  %v1414_v13 = vmul.f32 -1.442695, %v972_v51  ;;  %v1648_v52 = vpop.f32.mrb[20].mxu1 }
 0x3a3   : > { %1851 = vpow2.f32 %v1415_v50  ;;  %v1425_v15 = vmul.f32 -1.442695, %v1648_v52  ;;  %v1022_v53 = vpop.f32.mrb[21].mxu1 }
 0x3a4   : > { %1853 = vpow2.f32 %v1414_v13  ;;  %v1424_v56 = vmul.f32 -1.442695, %v1022_v53  ;;  %v1636_v57 = vpop.f32.mrb[6].mxu0 }
 0x3a5   : > { %1855 = vpow2.f32 %v1425_v15  ;;  %v1417_v16 = vmul.f32 -1.442695, %v1636_v57  ;;  %v982_v58 = vpop.f32.mrb[7].mxu0 }
 0x3a6   : > { %1857 = vpow2.f32 %v1424_v56  ;;  %v1416_v26 = vmul.f32 -1.442695, %v982_v58  ;;  %v1651_v48 = vpop.f32.mrb[22].mxu1 }
 0x3a7   : > { %v1032_v60 = vpop.f32.mrb[23].mxu1  ;;  %1859 = vpow2.f32 %v1417_v16  ;;  %v1427_v3 = vmul.f32 -1.442695, %v1651_v48 }
 0x3a8   : > { %v1639_v54 = vpop.f32.mrb[8].mxu0  ;;  %1861 = vpow2.f32 %v1416_v26  ;;  %v1426_v4 = vmul.f32 -1.442695, %v1032_v60  ;;  %v1907_v26 = vld [vmem:[%s2156_s11 + $0x88] sm:$0xff] }
 0x3a9   : > { %v1844_v37 = vpop.eup %1843  ;;  %v1419_v55 = vmul.f32 -1.442695, %v1639_v54  ;;  %v992_v41 = vpop.f32.mrb[9].mxu0  ;;  %v1908_v54 = vld [vmem:[%s2156_s11 + $0x80] sm:$0xff] }
 0x3aa   : > { %v1846_v59 = vpop.eup %1845  ;;  %v1090_v62 = vadd.f32 1.0, %v1844_v37  ;;  %v1418_v2 = vmul.f32 -1.442695, %v992_v41 }
 0x3ab   : > { %v1848_v19 = vpop.eup %1847  ;;  %v1089_v42 = vadd.f32 1.0, %v1846_v59  ;;  %1863 = vpow2.f32 %v1419_v55 }
 0x3ac   : > { %v1850_v44 = vpop.eup %1849  ;;  %1865 = vrcp.f32 %v1090_v62  ;;  %v1100_v20 = vadd.f32 1.0, %v1848_v19  ;;  %v1642_v45 = vpop.f32.mrb[10].mxu0 }
 0x3ad   : > { %v1852_v61 = vpop.eup %1851  ;;  %1867 = vrcp.f32 %v1089_v42  ;;  %v1099_v29 = vadd.f32 1.0, %v1850_v44  ;;  %v1002_v30 = vpop.f32.mrb[11].mxu0  ;;  %v1421_v0 = vmul.f32 -1.442695, %v1642_v45  ;;  %v1909_v42 = vld [vmem:[%s2156_s11 + $0x98] sm:$0xff]  ;;  %v1910_v45 = vld [vmem:[%s2156_s11 + $0x90] sm:$0xff] }
 0x3ae   : > { %v1854_v1 = vpop.eup %1853  ;;  %1869 = vrcp.f32 %v1100_v20  ;;  %v1092_v63 = vadd.f32 1.0, %v1852_v61  ;;  %v1420_v5 = vmul.f32 -1.442695, %v1002_v30 }
 0x3af   : > { %v1856_v17 = vpop.eup %1855  ;;  %1871 = vrcp.f32 %v1099_v29  ;;  %v1091_v18 = vadd.f32 1.0, %v1854_v1  ;;  %v1911_v29 = vld [vmem:[%s2156_s11 + $0xe8] sm:$0xff] }
 0x3b0   : > { %v1858_v21 = vpop.eup %1857  ;;  %v1102_v22 = vadd.f32 1.0, %v1856_v17  ;;  %1873 = vpow2.f32 %v1427_v3  ;;  %v1912_v3 = vld [vmem:[%s2156_s11 + $0xe0] sm:$0xff]  ;;  %v1913_v17 = vld [vmem:[%s2156_s11 + $0xa8] sm:$0xff] }
 0x3b1   : > { %v1101_v23 = vadd.f32 1.0, %v1858_v21  ;;  %1875 = vrcp.f32 %v1092_v63  ;;  %v1860_v24 = vpop.eup %1859 }
 0x3b2   : > { %1877 = vrcp.f32 %v1091_v18  ;;  %v1862_v25 = vpop.eup %1861  ;;  %v1094_v32 = vadd.f32 1.0, %v1860_v24  ;;  %v1915_v24 = vld [vmem:[%s2156_s11 + $0xb8] sm:$0xff] }
 0x3b3   : > { %1879 = vrcp.f32 %v1102_v22  ;;  %v1093_v6 = vadd.f32 1.0, %v1862_v25  ;;  %v1914_v22 = vld [vmem:[%s2156_s11 + $0xa0] sm:$0xff] }
 0x3b4   : > { %1881 = vrcp.f32 %v1101_v23 }
 0x3b5   : > { %v1864_v31 = vpop.eup %1863  ;;  %1883 = vpow2.f32 %v1418_v2 }
 0x3b6   : > { %v1866_v8 = vpop.eup %1865  ;;  %1885 = vpow2.f32 %v1421_v0  ;;  %v1096_v35 = vadd.f32 1.0, %v1864_v31 }
 0x3b7   : > { %v1868_v33 = vpop.eup %1867  ;;  %1144 = vperm.xlu0 %1778, %v1866_v8   ;;  %1887 = vpow2.f32 %v1426_v4  ;;  %v1916_v4 = vld [vmem:[%s2156_s11 + $0xb0] sm:$0xff]  ;;  %v1917_v8 = vld [vmem:[%s2156_s11 + $0xc8] sm:$0xff] }
 0x3b8   : > { %v1870_v10 = vpop.eup %1869  ;;  %1139 = vperm.xlu1 %1777, %v1868_v33   ;;  %1889 = vpow2.f32 %v1420_v5 }
 0x3b9   : > { %v1872_v34 = vpop.eup %1871  ;;  %1891 = vrcp.f32 %v1094_v32 }
 0x3ba   : > { %v1874_v36 = vpop.eup %1873  ;;  %1893 = vrcp.f32 %v1093_v6  ;;  %v1918_v6 = vld [vmem:[%s2156_s11 + $0xc0] sm:$0xff] }
 0x3bb   : > { %1194 = vperm.xlu0 %1778, %v1870_v10   ;;  %v1876_v7 = vpop.eup %1875  ;;  %1895 = vrcp.f32 %v1096_v35  ;;  %v1104_v46 = vadd.f32 1.0, %v1874_v36  ;;  %v1919_v35 = vld [vmem:[%s2156_s11 + $0xf8] sm:$0xff] }
 0x3bc   : > { %1189 = vperm.xlu1 %1777, %v1872_v34   ;;  %v1878_v12 = vpop.eup %1877 }
 0x3bd   : > { %v1880_v38 = vpop.eup %1879 }
 0x3be   : > { %v1882_v39 = vpop.eup %1881 }
 0x3bf   : > { %1154 = vperm.xlu0 %1778, %v1876_v7   ;;  %v1884_v40 = vpop.eup %1883 }
 0x3c0   : > { %1149 = vperm.xlu1 %1777, %v1878_v12   ;;  %v1886_v9 = vpop.eup %1885  ;;  %v1095_v43 = vadd.f32 1.0, %v1884_v40  ;;  %v1920_v12 = vld [vmem:[%s2156_s11 + $0xf0] sm:$0xff] }
 0x3c1   : > { %v1888_v14 = vpop.eup %1887  ;;  %v1098_v47 = vadd.f32 1.0, %v1886_v9 }
 0x3c2   : > { %v1890_v49 = vpop.eup %1889  ;;  %1897 = vrcp.f32 %v1095_v43  ;;  %v1103_v13 = vadd.f32 1.0, %v1888_v14 }
 0x3c3   : > { %1204 = vperm.xlu0 %1778, %v1880_v38   ;;  %v1892_v11 = vpop.eup %1891  ;;  %1899 = vrcp.f32 %v1098_v47  ;;  %v1097_v50 = vadd.f32 1.0, %v1890_v49 }
 0x3c4   : > { %1199 = vperm.xlu1 %1777, %v1882_v39   ;;  %v1894_v51 = vpop.eup %1893  ;;  %1901 = vrcp.f32 %v1104_v46 }
 0x3c5   : > { %1903 = vrcp.f32 %v1097_v50  ;;  %v1896_v52 = vpop.eup %1895 }
 0x3c6   : > { %1905 = vrcp.f32 %v1103_v13 }
 0x3c7   : > { %1164 = vperm.xlu0 %1778, %v1892_v11  }
 0x3c8   : > { %1159 = vperm.xlu1 %1777, %v1894_v51  }
 0x3cb   : > { %1174 = vperm.xlu0 %1778, %v1896_v52  }
 0x3cc   : > { %v1898_v15 = vpop.eup %1897 }
 0x3cd   : > { %v1900_v53 = vpop.eup %1899  ;;  %1169 = vperm.xlu1 %1777, %v1898_v15  }
 0x3ce   : > { %v1902_v56 = vpop.eup %1901 }
 0x3cf   : > { %1184 = vperm.xlu0 %1778, %v1900_v53   ;;  %v1904_v57 = vpop.eup %1903 }
 0x3d0   : > { %v1906_v16 = vpop.eup %1905 }
 0x3d1   : > { %1179 = vperm.xlu1 %1777, %v1904_v57  }
 0x3d3   : > { %1214 = vperm.xlu0 %1778, %v1902_v56  }
 0x3d5   : > { %1209 = vperm.xlu1 %1777, %v1906_v16  }
 0x436   : > { %v1145_v58 = vpop.permute.xlu0 %1144 }
 0x437   : > { %v1218_v48 = vmul.f32 %v1907_v26, %v1145_v58  ;;  %v1140_v60 = vpop.permute.xlu1 %1139 }
 0x438   : > { %v1217_v37 = vmul.f32 %v1908_v54, %v1140_v60 }
 0x439   : > { %1429 = vst [vmem:[%s2402_s19 + $0x88] sm:$0xff] %v1218_v48 }
 0x43a   : > { %1428 = vst [vmem:[%s2402_s19 + $0x80] sm:$0xff] %v1217_v37  ;;  %v1195_v55 = vpop.permute.xlu0 %1194 }
 0x43b   : > { %v1228_v41 = vmul.f32 %v2243_v27, %v1195_v55  ;;  %v1190_v59 = vpop.permute.xlu1 %1189 }
 0x43c   : > { %v1227_v62 = vmul.f32 %v2246_v28, %v1190_v59 }
 0x43d   : > { %1439 = vst [vmem:[%s2402_s19 + $0xd8] sm:$0xff] %v1228_v41 }
 0x43e   : > { %1438 = vst [vmem:[%s2402_s19 + $0xd0] sm:$0xff] %v1227_v62  ;;  %v1155_v19 = vpop.permute.xlu0 %1154 }
 0x43f   : > { %v1220_v44 = vmul.f32 %v1909_v42, %v1155_v19  ;;  %v1150_v20 = vpop.permute.xlu1 %1149 }
 0x440   : > { %v1219_v61 = vmul.f32 %v1910_v45, %v1150_v20 }
 0x441   : > { %1431 = vst [vmem:[%s2402_s19 + $0x98] sm:$0xff] %v1220_v44 }
 0x442   : > { %1430 = vst [vmem:[%s2402_s19 + $0x90] sm:$0xff] %v1219_v61  ;;  %v1205_v27 = vpop.permute.xlu0 %1204 }
 0x443   : > { %v1230_v28 = vmul.f32 %v1911_v29, %v1205_v27  ;;  %v1200_v30 = vpop.permute.xlu1 %1199 }
 0x444   : > { %v1229_v1 = vmul.f32 %v1912_v3, %v1200_v30 }
 0x445   : > { %1441 = vst [vmem:[%s2402_s19 + $0xe8] sm:$0xff] %v1230_v28 }
 0x446   : > { %1440 = vst [vmem:[%s2402_s19 + $0xe0] sm:$0xff] %v1229_v1  ;;  %v1165_v63 = vpop.permute.xlu0 %1164 }
 0x447   : > { %v1222_v18 = vmul.f32 %v1913_v17, %v1165_v63  ;;  %v1160_v21 = vpop.permute.xlu1 %1159 }
 0x448   : > { %v1221_v23 = vmul.f32 %v1914_v22, %v1160_v21 }
 0x449   : > { %1433 = vst [vmem:[%s2402_s19 + $0xa8] sm:$0xff] %v1222_v18 }
 0x44a   : > { %1432 = vst [vmem:[%s2402_s19 + $0xa0] sm:$0xff] %v1221_v23  ;;  %v1175_v2 = vpop.permute.xlu0 %1174 }
 0x44b   : > { %v1224_v0 = vmul.f32 %v1915_v24, %v1175_v2 }
 0x44c   : > { %v1170_v25 = vpop.permute.xlu1 %1169 }
 0x44d   : > { %1435 = vst [vmem:[%s2402_s19 + $0xb8] sm:$0xff] %v1224_v0  ;;  %v1223_v31 = vmul.f32 %v1916_v4, %v1170_v25 }
 0x44e   : > { %v1185_v5 = vpop.permute.xlu0 %1184 }
 0x44f   : > { %v1226_v32 = vmul.f32 %v1917_v8, %v1185_v5  ;;  %1434 = vst [vmem:[%s2402_s19 + $0xb0] sm:$0xff] %v1223_v31 }
 0x450   : > { %v1180_v33 = vpop.permute.xlu1 %1179 }
 0x451   : > { %1437 = vst [vmem:[%s2402_s19 + $0xc8] sm:$0xff] %v1226_v32  ;;  %v1225_v10 = vmul.f32 %v1918_v6, %v1180_v33 }
 0x452   : > { %v1215_v34 = vpop.permute.xlu0 %1214 }
 0x453   : > { %v1232_v36 = vmul.f32 %v1919_v35, %v1215_v34  ;;  %1436 = vst [vmem:[%s2402_s19 + $0xc0] sm:$0xff] %v1225_v10 }
 0x454   : > { %v1210_v7 = vpop.permute.xlu1 %1209 }
 0x455   : > { %1443 = vst [vmem:[%s2402_s19 + $0xf8] sm:$0xff] %v1232_v36  ;;  %v1231_v38 = vmul.f32 %v1920_v12, %v1210_v7 }
 0x457   : > { %1442 = vst [vmem:[%s2402_s19 + $0xf0] sm:$0xff] %v1231_v38 }
 0x458   : > { %1964 = shalt.err (!%p1961_p2)
}
 0x459   : > { %s1965_s11 = scalar_lea.hbm %s2469_s27, 4096  ;;  %s1969_s6 = scalar_lea.hbm %s2520_s3, 8192 }
 0x45a   : > { %p1966_p4 = scmp.ne.s32.totalorder %s2469_s27, %s1965_s11  ;;  %p1970_p9 = scmp.lt.u32.totalorder %s2469_s27, %s2520_s3 }
 0x45b   : > { %p1971_p1 = scmp.lt.u32.totalorder %s1969_s6, %s1965_s11  ;;  %p1973_p6 = scmp.lt.u32.totalorder %s1965_s11, %s2469_s27 }
 0x45c   : > { %p1967_p5 = pnand %p1966_p4, %p2527_p11 }
 0x45d   : > { %p1972_p3 = por %p1971_p1, %p1970_p9 }
 0x45e   : > { %p1968_p7 = pneg %p1967_p5 }
 0x45f   : > { %p1974_p12 = por %p1973_p6, %p1972_p3 }
 0x461   : > { %p1975_p13 = pnand %p1974_p12, %p1968_p7 }
 0x463   : > { %1978 = shalt.err (!%p1975_p13)
}
 0x464   : > { %s2024_s17 = smov 128   ;;  %s2025_s19 = smov 8  }
 0x465   : > { %1728 = dma.vmem_to_hbm [thread:$0]  (%p2527_p11), %s2471_s20, 4096, %s2469_s27, %s1251_s16, %s2024_s17, %s2024_s17, %s2025_s19  }
 0x466 PF: > { %s1280_s9 = sand.u32 1, %s2005_s12   ;;  %p2528_p8 = scmp.ne.s32.totalorder %s2525_s25, 0 }
 0x467   : > { %p2529_p10 = scmp.ge.s32.totalorder %s2017_s15, 2  ;;  %s1281_s22 = scalar_lea.sflag [#allocation4], %s1280_s9 }
 0x469   : > { %p1735_p0 = pnand %p2529_p10, %p2528_p8 }
 0x46b   : > { %2000 = dma.done.wait (!%p1735_p0), %s1281_s22, 4096  }
 0x46c   : > { %2002 = vsyncadd (!%p1735_p0), %s1281_s22, 4294963200  ;;  %p16_p2 = scmp.ge.s32.totalorder %s2071_s18, 4   ;;  %s2530_s12 = smov %s2009_s13 }
 0x46d   : > { %s2531_s13 = smov %s2013_s14  ;;  %s2532_s14 = smov %s2083_s21 }
 0x46e   : > { %s2533_s15 = smov %s2071_s18  ;;  %18 = sbr.rel (!%p16_p2) target bundleno = 5 (0x5), region = 79 }
 0x475   :  { %1286 = vsyncpa [#allocation3], 1 }
 0x476   :  { %1288 = vsyncpa [#allocation3 + $0x1], 1 }
 0x477   :  { %1289 = vsyncpa [#allocation4], 1 }
 0x478   :  { %1291 = vsyncpa [#allocation4 + $0x1], 1 }

</bundles_post_ra>
